<compile_context>
chip_gen: v6e
topology: v6e:2x2x1
jax: 0.10.0
libtpu: 0.0.40
codegen_flags: <defaults>
</compile_context>

<pallas_src>
import jax
import jax.numpy as jnp
import numpy as np
from jax.experimental import pallas as pl
from jax.experimental.pallas import tpu as pltpu

# ---------------------------------------------------------------------------
# Problem sizes (small, consistent with the module's forward)
# ---------------------------------------------------------------------------
B = 4          # batch
F = 256        # imfeatDim (2048 in the original; scaled down)
E = 128        # embDim    (1024 in the original; scaled down)
N_INGR = 10    # ingredient rows; conv over 3 rows -> 8 positions -> MaxPool((8,1)) -> 1


# ---------------------------------------------------------------------------
# Fused Pallas kernel (one batch tile per grid step; weights stay resident)
# ---------------------------------------------------------------------------
def img2img_feat_kernel(dish_ref, ingr_ref,
                        w1_ref, b1_ref, w2_ref, b2_ref,
                        wc_ref, bc_ref,
                        w3_ref, b3_ref,
                        w4_ref, b4_ref,
                        w5_ref, b5_ref,
                        out_ref):
    f32 = jnp.float32
    bf16 = jnp.bfloat16

    tb, n_rows, feat = ingr_ref.shape
    emb = w1_ref.shape[1]
    P = 8  # MaxPool2d((8, 1)): one 8-row window over the conv output (N=10 -> 8 positions)

    # ---- visual_embedding1: Linear -> Tanh -> Dropout(id) -> Linear -> Tanh
    h1 = jnp.tanh(jnp.dot(dish_ref[...].astype(bf16), w1_ref[...],
                          preferred_element_type=f32) + b1_ref[...])
    dish_emb = jnp.tanh(jnp.dot(h1.astype(bf16), w2_ref[...],
                                preferred_element_type=f32) + b2_ref[...])

    # ---- ingr_embedding: Conv2d(1, E, (3, F)) -> Tanh -> MaxPool2d((8, 1))
    # One fused matmul: project every ingredient row against all 3 row-offset
    # filter slices at once; the MXU does the K=F accumulation, only the
    # cross-row combine (3 shifted adds) runs on the VPU/XLU.
    ingr2d = ingr_ref[...].reshape(tb * n_rows, feat).astype(bf16)
    proj = jnp.dot(ingr2d, wc_ref[...], preferred_element_type=f32)   # (tb*N, 3E)
    proj = proj.reshape(tb, n_rows, 3 * emb)
    conv = (proj[:, 0:P,       0:emb]
            + proj[:, 1:P + 1, emb:2 * emb]
            + proj[:, 2:P + 2, 2 * emb:3 * emb]
            + bc_ref[...])                                            # (tb, 8, E)
    pooled = jnp.max(jnp.tanh(conv), axis=1)                          # (tb, E)

    # ---- ingr_embedding2: Linear -> Tanh
    ingr_emb = jnp.tanh(jnp.dot(pooled.astype(bf16), w3_ref[...],
                                preferred_element_type=f32) + b3_ref[...])

    # ---- score: cat([dish, ingr], 1) -> Linear(2E,E) -> Tanh -> Dropout(id) -> Linear(E,1)
    cat = jnp.concatenate([dish_emb, ingr_emb], axis=1).astype(bf16)  # (tb, 2E)
    s1 = jnp.tanh(jnp.dot(cat, w4_ref[...],
                          preferred_element_type=f32) + b4_ref[...])
    # Final Linear(E, 1) as VPU multiply + lane reduce (avoids an N=1 MXU matmul).
    out_ref[...] = jnp.sum(s1 * w5_ref[...], axis=-1, keepdims=True) + b5_ref[...]


def img2img_feat_pallas(dish_feat, ingr_feats, params, *, batch_tile=8):
    Bx, Fx = dish_feat.shape
    _, N, _ = ingr_feats.shape
    # The module's MaxPool2d((8,1)) + squeeze only yields a rank-2 (B, E)
    # tensor when N == 10 (8 conv positions -> exactly one pool window).
    # TODO(synk): for N > 10 PyTorch would emit extra pool windows and the
    # downstream Linear would fail; we mirror only the N == 10 contract.
    assert N >= 10, "module assumes 10 ingredient rows (8-wide max-pool window)"
    assert batch_tile % 8 == 0, "batch tile must be sublane-aligned"

    # Pad batch to a multiple of the batch tile and the ingredient-row axis to
    # a multiple of 8 (keeps in-kernel reshapes tile-aligned). Padded rows are
    # zero and never reach the pooled window.
    TB = batch_tile
    B_pad = ((Bx + TB - 1) // TB) * TB
    N_pad = ((N + 7) // 8) * 8
    dish_p = jnp.zeros((B_pad, Fx), dish_feat.dtype).at[:Bx].set(dish_feat)
    ingr_p = jnp.zeros((B_pad, N_pad, Fx), ingr_feats.dtype).at[:Bx, :N].set(ingr_feats)

    args = (dish_p, ingr_p,
            params["w1"], params["b1"], params["w2"], params["b2"],
            params["wc"], params["bc"],
            params["w3"], params["b3"],
            params["w4"], params["b4"],
            params["w5"], params["b5"])

    def resident(x):
        # Full-array block, same block index every grid step -> loaded once,
        # stays resident in VMEM while batch tiles stream through.
        return pl.BlockSpec(x.shape, lambda i, _nd=x.ndim: (0,) * _nd)

    in_specs = [
        pl.BlockSpec((TB, Fx), lambda i: (i, 0)),
        pl.BlockSpec((TB, N_pad, Fx), lambda i: (i, 0, 0)),
    ] + [resident(a) for a in args[2:]]

    out = pl.pallas_call(
        img2img_feat_kernel,
        out_shape=jax.ShapeDtypeStruct((B_pad, 1), jnp.float32),
        grid=(B_pad // TB,),
        in_specs=in_specs,
        out_specs=pl.BlockSpec((TB, 1), lambda i: (i, 0)),
        compiler_params=pltpu.CompilerParams(
            dimension_semantics=("parallel",),
            # Headroom so the resident-weight design also compiles at the
            # production sizes (F=2048, E=1024, bf16 weights ~24 MiB) on
            # v5e / v6e / v7x without spills.
            vmem_limit_bytes=32 * 1024 * 1024,
        ),
    )(*args)
    return out[:Bx]


# ---------------------------------------------------------------------------
# Pure-JAX reference (mirrors the PyTorch forward in eval mode).
# matmul_dtype=bf16 reproduces the kernel's matmul numerics exactly;
# matmul_dtype=f32 is a loose full-precision sanity check.
# ---------------------------------------------------------------------------
def img2img_feat_ref(dish_feat, ingr_feats, p, matmul_dtype=jnp.bfloat16):
    f32 = jnp.float32

    def mm(x, w):
        return jnp.dot(x.astype(matmul_dtype), w.astype(matmul_dtype),
                       preferred_element_type=f32)

    h1 = jnp.tanh(mm(dish_feat, p["w1"]) + p["b1"])
    dish_emb = jnp.tanh(mm(h1, p["w2"]) + p["b2"])

    _, N, _ = ingr_feats.shape
    emb = p["w1"].shape[1]
    convs = []
    for h in range(N - 2):
        acc = p["bc"].astype(f32)
        for r in range(3):
            acc = acc + mm(ingr_feats[:, h + r, :], p["wc"][:, r * emb:(r + 1) * emb])
        convs.append(jnp.tanh(acc))
    conv = jnp.stack(convs, axis=1)                # (B, N-2, E)
    pooled = jnp.max(conv[:, :8, :], axis=1)       # MaxPool2d((8,1)), single window

    ingr_emb = jnp.tanh(mm(pooled, p["w3"]) + p["b3"])

    cat = jnp.concatenate([dish_emb, ingr_emb], axis=1)
    s1 = jnp.tanh(mm(cat, p["w4"]) + p["b4"])
    return jnp.sum(s1 * p["w5"].astype(f32), axis=-1, keepdims=True) + p["b5"]


# ---------------------------------------------------------------------------
# Deterministic parameter initialization (shapes from the module __init__).
# Matmul weights are stored bf16 (halved DMA bytes, full-rate MXU on v6e/v7x);
# biases and the final (E,1) weight stay f32 (used on the VPU path).
# ---------------------------------------------------------------------------
def init_params(key):
    ks = jax.random.split(key, 12)
    scale = 0.05
    f32, bf16 = jnp.float32, jnp.bfloat16

    def w(k, shape):
        return scale * jax.random.normal(k, shape, f32)

    return {
        # visual_embedding1: Linear(F,E) -> Tanh -> Dropout -> Linear(E,E) -> Tanh
        "w1": w(ks[0], (F, E)).astype(bf16),
        "b1": w(ks[1], (1, E)),
        "w2": w(ks[2], (E, E)).astype(bf16),
        "b2": w(ks[3], (1, E)),
        # ingr_embedding: Conv2d(1, E, (3, F)) weight (E,1,3,F) packed as (F, 3E),
        # columns [r*E:(r+1)*E] = row-offset-r filter slice.
        "wc": w(ks[4], (F, 3 * E)).astype(bf16),
        "bc": w(ks[5], (1, E)),
        # ingr_embedding2: Linear(E,E)
        "w3": w(ks[6], (E, E)).astype(bf16),
        "b3": w(ks[7], (1, E)),
        # score: Linear(2E, E) kept as one fused weight, then Linear(E, 1)
        "w4": w(ks[8], (2 * E, E)).astype(bf16),
        "b4": w(ks[9], (1, E)),
        "w5": w(ks[10], (1, E)),   # final Linear(E,1) weight as a row vector (f32)
        "b5": w(ks[11], (1, 1)),
    }


if __name__ == "__main__":
    key = jax.random.PRNGKey(0)
    k_dish, k_ingr, k_par = jax.random.split(key, 3)

    dish_feat = jax.random.normal(k_dish, (B, F), jnp.float32)
    ingr_feats = jax.random.normal(k_ingr, (B, N_INGR, F), jnp.float32)
    params = init_params(k_par)

    out = jax.block_until_ready(img2img_feat_pallas(dish_feat, ingr_feats, params))
    assert out.shape == (B, 1), out.shape

    # Primary check: reference with identical bf16-in / f32-accumulate matmuls.
    ref_bf16 = jax.block_until_ready(
        img2img_feat_ref(dish_feat, ingr_feats, params, jnp.bfloat16))
    np.testing.assert_allclose(np.asarray(out), np.asarray(ref_bf16),
                               rtol=2e-3, atol=2e-3)

    # Loose sanity check against full-f32 math (only matmul precision differs).
    ref_f32 = jax.block_until_ready(
        img2img_feat_ref(dish_feat, ingr_feats, params, jnp.float32))
    np.testing.assert_allclose(np.asarray(out), np.asarray(ref_f32),
                               rtol=1e-1, atol=1e-1)

    print("KERNEL_OK")
</pallas_src>

<mosaic_0001>
module attributes {stable_mosaic.version = 11 : i64} {
  func.func @img2img_feat_kernel(%arg0: i32, %arg1: memref<8x256xf32, #tpu.memory_space<vmem>>, %arg2: memref<8x16x256xf32, #tpu.memory_space<vmem>>, %arg3: memref<256x128xbf16, #tpu.memory_space<vmem>>, %arg4: memref<1x128xf32, #tpu.memory_space<vmem>>, %arg5: memref<128x128xbf16, #tpu.memory_space<vmem>>, %arg6: memref<1x128xf32, #tpu.memory_space<vmem>>, %arg7: memref<256x384xbf16, #tpu.memory_space<vmem>>, %arg8: memref<1x128xf32, #tpu.memory_space<vmem>>, %arg9: memref<128x128xbf16, #tpu.memory_space<vmem>>, %arg10: memref<1x128xf32, #tpu.memory_space<vmem>>, %arg11: memref<256x128xbf16, #tpu.memory_space<vmem>>, %arg12: memref<1x128xf32, #tpu.memory_space<vmem>>, %arg13: memref<1x128xf32, #tpu.memory_space<vmem>>, %arg14: memref<1x1xf32, #tpu.memory_space<vmem>>, %arg15: memref<8x1xf32, #tpu.memory_space<vmem>>) attributes {dimension_semantics = [#tpu.dimension_semantics<parallel>], iteration_bounds = array<i64: 1>, scalar_prefetch = 0 : i64, scratch_operands = 0 : i64, tpu.core_type = #tpu.core_type<tc>, window_params = [{transform_indices = @transform_0, window_bounds = array<i64: 8, 256>}, {transform_indices = @transform_1, window_bounds = array<i64: 8, 16, 256>}, {pipeline_mode = #tpu.pipeline_mode<synchronous>, transform_indices = @transform_2, window_bounds = array<i64: 256, 128>}, {pipeline_mode = #tpu.pipeline_mode<synchronous>, transform_indices = @transform_3, window_bounds = array<i64: 1, 128>}, {pipeline_mode = #tpu.pipeline_mode<synchronous>, transform_indices = @transform_4, window_bounds = array<i64: 128, 128>}, {pipeline_mode = #tpu.pipeline_mode<synchronous>, transform_indices = @transform_5, window_bounds = array<i64: 1, 128>}, {pipeline_mode = #tpu.pipeline_mode<synchronous>, transform_indices = @transform_6, window_bounds = array<i64: 256, 384>}, {pipeline_mode = #tpu.pipeline_mode<synchronous>, transform_indices = @transform_7, window_bounds = array<i64: 1, 128>}, {pipeline_mode = #tpu.pipeline_mode<synchronous>, transform_indices = @transform_8, window_bounds = array<i64: 128, 128>}, {pipeline_mode = #tpu.pipeline_mode<synchronous>, transform_indices = @transform_9, window_bounds = array<i64: 1, 128>}, {pipeline_mode = #tpu.pipeline_mode<synchronous>, transform_indices = @transform_10, window_bounds = array<i64: 256, 128>}, {pipeline_mode = #tpu.pipeline_mode<synchronous>, transform_indices = @transform_11, window_bounds = array<i64: 1, 128>}, {pipeline_mode = #tpu.pipeline_mode<synchronous>, transform_indices = @transform_12, window_bounds = array<i64: 1, 128>}, {pipeline_mode = #tpu.pipeline_mode<synchronous>, transform_indices = @transform_13, window_bounds = array<i64: 1, 1>}, {transform_indices = @transform_14, window_bounds = array<i64: 8, 1>}]} {
    %c0 = arith.constant 0 : index
    %c0_0 = arith.constant 0 : index
    %0 = vector.load %arg1[%c0, %c0_0] : memref<8x256xf32, #tpu.memory_space<vmem>>, vector<8x256xf32>
    %1 = arith.truncf %0 : vector<8x256xf32> to vector<8x256xbf16>
    %c0_1 = arith.constant 0 : index
    %c0_2 = arith.constant 0 : index
    %2 = vector.load %arg3[%c0_1, %c0_2] : memref<256x128xbf16, #tpu.memory_space<vmem>>, vector<256x128xbf16>
    %cst = arith.constant dense<0.000000e+00> : vector<8x128xf32>
    %3 = tpu.matmul %1, %2, %cst {dimension_numbers = #tpu.dot_dimension_numbers<[1], [0], [0], [1], [0, 0, 1, 1], [], []>} : vector<8x256xbf16>, vector<256x128xbf16>, vector<8x128xf32> -> vector<8x128xf32>
    %c0_3 = arith.constant 0 : index
    %c0_4 = arith.constant 0 : index
    %4 = vector.load %arg4[%c0_3, %c0_4] : memref<1x128xf32, #tpu.memory_space<vmem>>, vector<1x128xf32>
    %5 = vector.broadcast %4 : vector<1x128xf32> to vector<8x128xf32>
    %6 = arith.addf %3, %5 : vector<8x128xf32>
    %7 = math.tanh %6 : vector<8x128xf32>
    %8 = arith.truncf %7 : vector<8x128xf32> to vector<8x128xbf16>
    %c0_5 = arith.constant 0 : index
    %c0_6 = arith.constant 0 : index
    %9 = vector.load %arg5[%c0_5, %c0_6] : memref<128x128xbf16, #tpu.memory_space<vmem>>, vector<128x128xbf16>
    %cst_7 = arith.constant dense<0.000000e+00> : vector<8x128xf32>
    %10 = tpu.matmul %8, %9, %cst_7 {dimension_numbers = #tpu.dot_dimension_numbers<[1], [0], [0], [1], [0, 0, 1, 1], [], []>} : vector<8x128xbf16>, vector<128x128xbf16>, vector<8x128xf32> -> vector<8x128xf32>
    %c0_8 = arith.constant 0 : index
    %c0_9 = arith.constant 0 : index
    %11 = vector.load %arg6[%c0_8, %c0_9] : memref<1x128xf32, #tpu.memory_space<vmem>>, vector<1x128xf32>
    %12 = vector.broadcast %11 : vector<1x128xf32> to vector<8x128xf32>
    %13 = arith.addf %10, %12 : vector<8x128xf32>
    %14 = math.tanh %13 : vector<8x128xf32>
    %c0_10 = arith.constant 0 : index
    %c0_11 = arith.constant 0 : index
    %c0_12 = arith.constant 0 : index
    %15 = vector.load %arg2[%c0_10, %c0_11, %c0_12] : memref<8x16x256xf32, #tpu.memory_space<vmem>>, vector<8x16x256xf32>
    %16 = vector.shape_cast %15 : vector<8x16x256xf32> to vector<128x256xf32>
    %17 = arith.truncf %16 : vector<128x256xf32> to vector<128x256xbf16>
    %c0_13 = arith.constant 0 : index
    %c0_14 = arith.constant 0 : index
    %18 = vector.load %arg7[%c0_13, %c0_14] : memref<256x384xbf16, #tpu.memory_space<vmem>>, vector<256x384xbf16>
    %cst_15 = arith.constant dense<0.000000e+00> : vector<128x384xf32>
    %19 = tpu.matmul %17, %18, %cst_15 {dimension_numbers = #tpu.dot_dimension_numbers<[1], [0], [0], [1], [0, 0, 1, 1], [], []>} : vector<128x256xbf16>, vector<256x384xbf16>, vector<128x384xf32> -> vector<128x384xf32>
    %20 = vector.shape_cast %19 : vector<128x384xf32> to vector<8x16x384xf32>
    %21 = vector.extract_strided_slice %20 {offsets = [0, 0, 0], sizes = [8, 8, 128], strides = [1, 1, 1]} : vector<8x16x384xf32> to vector<8x8x128xf32>
    %22 = vector.extract_strided_slice %20 {offsets = [0, 1, 128], sizes = [8, 8, 128], strides = [1, 1, 1]} : vector<8x16x384xf32> to vector<8x8x128xf32>
    %23 = arith.addf %21, %22 : vector<8x8x128xf32>
    %24 = vector.extract_strided_slice %20 {offsets = [0, 2, 256], sizes = [8, 8, 128], strides = [1, 1, 1]} : vector<8x16x384xf32> to vector<8x8x128xf32>
    %25 = arith.addf %23, %24 : vector<8x8x128xf32>
    %c0_16 = arith.constant 0 : index
    %c0_17 = arith.constant 0 : index
    %26 = vector.load %arg8[%c0_16, %c0_17] : memref<1x128xf32, #tpu.memory_space<vmem>>, vector<1x128xf32>
    %27 = vector.shape_cast %26 : vector<1x128xf32> to vector<1x1x128xf32>
    %28 = vector.broadcast %27 : vector<1x1x128xf32> to vector<8x8x128xf32>
    %29 = arith.addf %25, %28 : vector<8x8x128xf32>
    %30 = math.tanh %29 : vector<8x8x128xf32>
    %cst_18 = arith.constant dense<0xFF800000> : vector<8x128xf32>
    %31 = vector.multi_reduction <maximumf>, %30, %cst_18 [1] : vector<8x8x128xf32> to vector<8x128xf32>
    %32 = arith.truncf %31 : vector<8x128xf32> to vector<8x128xbf16>
    %c0_19 = arith.constant 0 : index
    %c0_20 = arith.constant 0 : index
    %33 = vector.load %arg9[%c0_19, %c0_20] : memref<128x128xbf16, #tpu.memory_space<vmem>>, vector<128x128xbf16>
    %cst_21 = arith.constant dense<0.000000e+00> : vector<8x128xf32>
    %34 = tpu.matmul %32, %33, %cst_21 {dimension_numbers = #tpu.dot_dimension_numbers<[1], [0], [0], [1], [0, 0, 1, 1], [], []>} : vector<8x128xbf16>, vector<128x128xbf16>, vector<8x128xf32> -> vector<8x128xf32>
    %c0_22 = arith.constant 0 : index
    %c0_23 = arith.constant 0 : index
    %35 = vector.load %arg10[%c0_22, %c0_23] : memref<1x128xf32, #tpu.memory_space<vmem>>, vector<1x128xf32>
    %36 = vector.broadcast %35 : vector<1x128xf32> to vector<8x128xf32>
    %37 = arith.addf %34, %36 : vector<8x128xf32>
    %38 = math.tanh %37 : vector<8x128xf32>
    %39 = tpu.concatenate %14, %38 in 1 : vector<8x128xf32>, vector<8x128xf32> -> vector<8x256xf32>
    %40 = arith.truncf %39 : vector<8x256xf32> to vector<8x256xbf16>
    %c0_24 = arith.constant 0 : index
    %c0_25 = arith.constant 0 : index
    %41 = vector.load %arg11[%c0_24, %c0_25] : memref<256x128xbf16, #tpu.memory_space<vmem>>, vector<256x128xbf16>
    %cst_26 = arith.constant dense<0.000000e+00> : vector<8x128xf32>
    %42 = tpu.matmul %40, %41, %cst_26 {dimension_numbers = #tpu.dot_dimension_numbers<[1], [0], [0], [1], [0, 0, 1, 1], [], []>} : vector<8x256xbf16>, vector<256x128xbf16>, vector<8x128xf32> -> vector<8x128xf32>
    %c0_27 = arith.constant 0 : index
    %c0_28 = arith.constant 0 : index
    %43 = vector.load %arg12[%c0_27, %c0_28] : memref<1x128xf32, #tpu.memory_space<vmem>>, vector<1x128xf32>
    %44 = vector.broadcast %43 : vector<1x128xf32> to vector<8x128xf32>
    %45 = arith.addf %42, %44 : vector<8x128xf32>
    %46 = math.tanh %45 : vector<8x128xf32>
    %c0_29 = arith.constant 0 : index
    %c0_30 = arith.constant 0 : index
    %47 = vector.load %arg13[%c0_29, %c0_30] : memref<1x128xf32, #tpu.memory_space<vmem>>, vector<1x128xf32>
    %48 = vector.broadcast %47 : vector<1x128xf32> to vector<8x128xf32>
    %49 = arith.mulf %46, %48 : vector<8x128xf32>
    %cst_31 = arith.constant dense<0.000000e+00> : vector<8xf32>
    %50 = vector.multi_reduction <add>, %49, %cst_31 [1] : vector<8x128xf32> to vector<8xf32>
    %51 = vector.shape_cast %50 : vector<8xf32> to vector<8x1xf32>
    %c0_32 = arith.constant 0 : index
    %c0_33 = arith.constant 0 : index
    %52 = vector.load %arg14[%c0_32, %c0_33] : memref<1x1xf32, #tpu.memory_space<vmem>>, vector<1x1xf32>
    %53 = vector.broadcast %52 : vector<1x1xf32> to vector<8x1xf32>
    %54 = arith.addf %51, %53 : vector<8x1xf32>
    %c0_34 = arith.constant 0 : index
    %c0_35 = arith.constant 0 : index
    %55 = vector.load %arg15[%c0_34, %c0_35] : memref<8x1xf32, #tpu.memory_space<vmem>>, vector<8x1xf32>
    tpu.vector_store %arg15[%c0_34, %c0_35], %54 {strides = array<i32>} : memref<8x1xf32, #tpu.memory_space<vmem>>, vector<8x1xf32>,
    return
  }
  func.func @transform_0(%arg0: i32) -> (i32, i32) {
    %c0_i32 = arith.constant 0 : i32
    %c0_i32_0 = arith.constant 0 : i32
    return %arg0, %c0_i32 : i32, i32
  }
  func.func @transform_1(%arg0: i32) -> (i32, i32, i32) {
    %c0_i32 = arith.constant 0 : i32
    %c0_i32_0 = arith.constant 0 : i32
    %c0_i32_1 = arith.constant 0 : i32
    return %arg0, %c0_i32, %c0_i32_0 : i32, i32, i32
  }
  func.func @transform_2(%arg0: i32) -> (i32, i32) {
    %c0_i32 = arith.constant 0 : i32
    %c0_i32_0 = arith.constant 0 : i32
    %c0_i32_1 = arith.constant 0 : i32
    return %c0_i32, %c0_i32_0 : i32, i32
  }
  func.func @transform_3(%arg0: i32) -> (i32, i32) {
    %c0_i32 = arith.constant 0 : i32
    %c0_i32_0 = arith.constant 0 : i32
    %c0_i32_1 = arith.constant 0 : i32
    return %c0_i32, %c0_i32_0 : i32, i32
  }
  func.func @transform_4(%arg0: i32) -> (i32, i32) {
    %c0_i32 = arith.constant 0 : i32
    %c0_i32_0 = arith.constant 0 : i32
    %c0_i32_1 = arith.constant 0 : i32
    return %c0_i32, %c0_i32_0 : i32, i32
  }
  func.func @transform_5(%arg0: i32) -> (i32, i32) {
    %c0_i32 = arith.constant 0 : i32
    %c0_i32_0 = arith.constant 0 : i32
    %c0_i32_1 = arith.constant 0 : i32
    return %c0_i32, %c0_i32_0 : i32, i32
  }
  func.func @transform_6(%arg0: i32) -> (i32, i32) {
    %c0_i32 = arith.constant 0 : i32
    %c0_i32_0 = arith.constant 0 : i32
    %c0_i32_1 = arith.constant 0 : i32
    return %c0_i32, %c0_i32_0 : i32, i32
  }
  func.func @transform_7(%arg0: i32) -> (i32, i32) {
    %c0_i32 = arith.constant 0 : i32
    %c0_i32_0 = arith.constant 0 : i32
    %c0_i32_1 = arith.constant 0 : i32
    return %c0_i32, %c0_i32_0 : i32, i32
  }
  func.func @transform_8(%arg0: i32) -> (i32, i32) {
    %c0_i32 = arith.constant 0 : i32
    %c0_i32_0 = arith.constant 0 : i32
    %c0_i32_1 = arith.constant 0 : i32
    return %c0_i32, %c0_i32_0 : i32, i32
  }
  func.func @transform_9(%arg0: i32) -> (i32, i32) {
    %c0_i32 = arith.constant 0 : i32
    %c0_i32_0 = arith.constant 0 : i32
    %c0_i32_1 = arith.constant 0 : i32
    return %c0_i32, %c0_i32_0 : i32, i32
  }
  func.func @transform_10(%arg0: i32) -> (i32, i32) {
    %c0_i32 = arith.constant 0 : i32
    %c0_i32_0 = arith.constant 0 : i32
    %c0_i32_1 = arith.constant 0 : i32
    return %c0_i32, %c0_i32_0 : i32, i32
  }
  func.func @transform_11(%arg0: i32) -> (i32, i32) {
    %c0_i32 = arith.constant 0 : i32
    %c0_i32_0 = arith.constant 0 : i32
    %c0_i32_1 = arith.constant 0 : i32
    return %c0_i32, %c0_i32_0 : i32, i32
  }
  func.func @transform_12(%arg0: i32) -> (i32, i32) {
    %c0_i32 = arith.constant 0 : i32
    %c0_i32_0 = arith.constant 0 : i32
    %c0_i32_1 = arith.constant 0 : i32
    return %c0_i32, %c0_i32_0 : i32, i32
  }
  func.func @transform_13(%arg0: i32) -> (i32, i32) {
    %c0_i32 = arith.constant 0 : i32
    %c0_i32_0 = arith.constant 0 : i32
    %c0_i32_1 = arith.constant 0 : i32
    return %c0_i32, %c0_i32_0 : i32, i32
  }
  func.func @transform_14(%arg0: i32) -> (i32, i32) {
    %c0_i32 = arith.constant 0 : i32
    %c0_i32_0 = arith.constant 0 : i32
    return %arg0, %c0_i32 : i32, i32
  }
}

</mosaic_0001>

<bundles_post_ra>
// kernel: tpu_custom_call.1
= control target key start
LH: loop header
LB: loop body
LE: loop exit
PB: predicated region body
PF: predicated region fallthrough
CT: control target
= control target key end

     0   :  { %s2393_s0 = inlined_call_operand.hbm [shape: f32[8,256], index: 0, kind: input, shape index: {}]   ;;  %s2394_s1 = inlined_call_operand.hbm [shape: f32[8,16,256], index: 1, kind: input, shape index: {}]   ;;  %s2395_s2 = inlined_call_operand.hbm [shape: bf16[256,128], index: 2, kind: input, shape index: {}]   ;;  %s2396_s3 = inlined_call_operand.vmem [shape: f32[1,128], index: 3, kind: input, shape index: {}]   ;;  %s2397_s4 = inlined_call_operand.hbm [shape: bf16[128,128], index: 4, kind: input, shape index: {}]   ;;  %s2398_s5 = inlined_call_operand.vmem [shape: f32[1,128], index: 5, kind: input, shape index: {}]   ;;  %s2399_s6 = inlined_call_operand.hbm [shape: bf16[256,384], index: 6, kind: input, shape index: {}]   ;;  %s2400_s7 = inlined_call_operand.vmem [shape: f32[1,128], index: 7, kind: input, shape index: {}]   ;;  %s2401_s8 = inlined_call_operand.hbm [shape: bf16[128,128], index: 8, kind: input, shape index: {}]   ;;  %s2402_s9 = inlined_call_operand.vmem [shape: f32[1,128], index: 9, kind: input, shape index: {}]   ;;  %s2403_s10 = inlined_call_operand.hbm [shape: bf16[256,128], index: 10, kind: input, shape index: {}]   ;;  %s2404_s11 = inlined_call_operand.vmem [shape: f32[1,128], index: 11, kind: input, shape index: {}]   ;;  %s2405_s12 = inlined_call_operand.vmem [shape: f32[1,128], index: 12, kind: input, shape index: {}]   ;;  %s2406_s13 = inlined_call_operand.<no memory space> [shape: f32[1,1], index: 13, kind: input, shape index: {}]   ;;  %s2407_s14 = inlined_call_operand.vmem [shape: f32[8,1], index: 14, kind: output, shape index: {}]  }
   0x1   :  { %v19_v0 = vstv %s2406_s13 }
   0x2   :  { %20 = vst [vmem:[#allocation2] sm:$0x1] %v19_v0 }
   0x3   :  { %21 = vsyncpa [#allocation4], 0 }
   0x4   :  { %22 = vsyncpa [#allocation6], 0 }
   0x5   :  { %23 = vsyncpa [#allocation9], 0 }
   0x6   :  { %24 = vsyncpa [#allocation12], 0  ;;  %s2117_s15 = smov [#allocation5]  }
   0x7   :  { %s40_s16 = sshll.u32 %s2117_s15, 4  ;;  %s41_s16 = int_to_ptr.vmem [resolvable:$true] %s40_s16 }
   0x8   :  { %s1977_s17 = scalar_lea.vmem %s41_s16, 4096  ;;  %p1982_p1 = scmp.lt.s32.totalorder %s41_s16, %s41_s16 }
   0x9   :  { %p1978_p0 = scmp.ne.s32.totalorder %s41_s16, %s1977_s17  ;;  %p1983_p2 = scmp.lt.s32.totalorder %s1977_s17, %s1977_s17 }
   0xb   :  { %p1984_p3 = por %p1983_p2, %p1982_p1 }
   0xd   :  { %p1985_p4 = pnand %p1984_p3, %p1978_p0 }
   0xf   :  { %1988 = shalt.err (!%p1985_p4)
}
  0x10   :  { %s2118_s18 = smov 256   ;;  %s2119_s19 = smov 16  }
  0x11   :  { %46 = dma.hbm_to_vmem [thread:$0]  %s2394_s1, 4096, %s41_s16, [#allocation6], %s2118_s18, %s2118_s18, %s2119_s19  }
  0x12   :  { %s2120_s13 = smov [#allocation8]   ;;  %s2121_s23 = smov [#allocation11]  }
  0x13   :  { %s66_s22 = sshll.u32 %s2120_s13, 4  ;;  %s94_s24 = sshll.u32 %s2121_s23, 4  ;;  %s67_s22 = int_to_ptr.vmem [resolvable:$true] %s66_s22  ;;  %s95_s24 = int_to_ptr.vmem [resolvable:$true] %s94_s24 }
  0x14   :  { %s1997_s25 = scalar_lea.vmem %s67_s22, 1024  ;;  %p2002_p6 = scmp.lt.s32.totalorder %s67_s22, %s67_s22 }
  0x15   :  { %p1998_p5 = scmp.ne.s32.totalorder %s67_s22, %s1997_s25  ;;  %p2003_p7 = scmp.lt.s32.totalorder %s1997_s25, %s1997_s25 }
  0x17   :  { %p2004_p8 = por %p2003_p7, %p2002_p6 }
  0x19   :  { %p2005_p9 = pnand %p2004_p8, %p1998_p5 }
  0x1b   :  { %2008 = shalt.err (!%p2005_p9)
}
  0x1c   :  { %s2122_s26 = smov 64   ;;  %s2123_s27 = smov 4  }
  0x1d   :  { %72 = dma.hbm_to_vmem [thread:$0]  %s2397_s4, 1024, %s67_s22, [#allocation9], %s2122_s26, %s2122_s26, %s2123_s27  }
  0x1e   :  { %s2017_s1 = scalar_lea.vmem %s95_s24, 1024  ;;  %p2022_p11 = scmp.lt.s32.totalorder %s95_s24, %s95_s24 }
  0x1f   :  { %p2018_p10 = scmp.ne.s32.totalorder %s95_s24, %s2017_s1  ;;  %p2023_p12 = scmp.lt.s32.totalorder %s2017_s1, %s2017_s1 }
  0x21   :  { %p2024_p13 = por %p2023_p12, %p2022_p11 }
  0x23   :  { %p2025_p0 = pnand %p2024_p13, %p2018_p10 }
  0x25   :  { %2028 = shalt.err (!%p2025_p0)
}
  0x26   :  { %100 = dma.hbm_to_vmem [thread:$0]  %s2401_s8, 1024, %s95_s24, [#allocation12], %s2122_s26, %s2122_s26, %s2123_s27  }
  0x27   :  { %s2124_s16 = smov [#allocation3]   ;;  %s2125_s18 = smov [#allocation7]  }
  0x28   :  { %s31_s17 = sshll.u32 %s2124_s16, 4  ;;  %s52_s4 = sshll.u32 %s2125_s18, 4  ;;  %s32_s17 = int_to_ptr.vmem [resolvable:$true] %s31_s17  ;;  %s53_s4 = int_to_ptr.vmem [resolvable:$true] %s52_s4 }
  0x29   :  { %s2037_s19 = scalar_lea.vmem %s32_s17, 256  ;;  %p2042_p2 = scmp.lt.s32.totalorder %s32_s17, %s32_s17 }
  0x2a   :  { %p2038_p1 = scmp.ne.s32.totalorder %s32_s17, %s2037_s19  ;;  %p2043_p3 = scmp.lt.s32.totalorder %s2037_s19, %s2037_s19 }
  0x2c   :  { %p2044_p4 = por %p2043_p3, %p2042_p2 }
  0x2e   :  { %p2045_p5 = pnand %p2044_p4, %p2038_p1 }
  0x30   :  { %2048 = shalt.err (!%p2045_p5)
}
  0x31   :  { %34 = dma.hbm_to_vmem [thread:$0]  %s2393_s0, 256, %s32_s17, [#allocation4]  }
  0x32   :  { %s2057_s13 = scalar_lea.vmem %s53_s4, 2048  ;;  %p2062_p7 = scmp.lt.s32.totalorder %s53_s4, %s53_s4 }
  0x33   :  { %p2058_p6 = scmp.ne.s32.totalorder %s53_s4, %s2057_s13  ;;  %p2063_p8 = scmp.lt.s32.totalorder %s2057_s13, %s2057_s13 }
  0x35   :  { %p2064_p9 = por %p2063_p8, %p2062_p7 }
  0x37   :  { %p2065_p10 = pnand %p2064_p9, %p2058_p6 }
  0x39   :  { %2068 = shalt.err (!%p2065_p10)
}
  0x3a   :  { %58 = dma.hbm_to_vmem [thread:$0]  %s2395_s2, 2048, %s53_s4, [#allocation6], %s2122_s26, %s2122_s26, %s2123_s27  }
  0x3b   :  { %s2126_s23 = smov [#allocation10]  }
  0x3c   :  { %s80_s24 = sshll.u32 %s2126_s23, 4  ;;  %s81_s24 = int_to_ptr.vmem [resolvable:$true] %s80_s24 }
  0x3d   :  { %s2077_s25 = scalar_lea.vmem %s81_s24, 6144  ;;  %p2082_p12 = scmp.lt.s32.totalorder %s81_s24, %s81_s24 }
  0x3e   :  { %p2078_p11 = scmp.ne.s32.totalorder %s81_s24, %s2077_s25  ;;  %p2083_p13 = scmp.lt.s32.totalorder %s2077_s25, %s2077_s25 }
  0x40   :  { %p2084_p0 = por %p2083_p13, %p2082_p12 }
  0x42   :  { %p2085_p1 = pnand %p2084_p0, %p2078_p11 }
  0x44   :  { %2088 = shalt.err (!%p2085_p1)
}
  0x45   :  { %s2127_s0 = smov 192   ;;  %s2128_s28 = smov 12  }
  0x46   :  { %86 = dma.hbm_to_vmem [thread:$0]  %s2399_s6, 6144, %s81_s24, [#allocation9], %s2127_s0, %s2127_s0, %s2128_s28  }
  0x47   :  { %s2129_s30 = smov [#allocation13]  }
  0x48   :  { %s108_s15 = sshll.u32 %s2129_s30, 4  ;;  %s109_s15 = int_to_ptr.vmem [resolvable:$true] %s108_s15 }
  0x49   :  { %s2097_s2 = scalar_lea.vmem %s109_s15, 2048  ;;  %p2102_p3 = scmp.lt.s32.totalorder %s109_s15, %s109_s15 }
  0x4a   :  { %p2098_p2 = scmp.ne.s32.totalorder %s109_s15, %s2097_s2  ;;  %p2103_p4 = scmp.lt.s32.totalorder %s2097_s2, %s2097_s2 }
  0x4c   :  { %p2104_p5 = por %p2103_p4, %p2102_p3 }
  0x4e   :  { %p2105_p6 = pnand %p2104_p5, %p2098_p2 }
  0x50   :  { %2108 = shalt.err (!%p2105_p6)
}
  0x51   :  { %114 = dma.hbm_to_vmem [thread:$0]  %s2403_s10, 2048, %s109_s15, [#allocation12], %s2122_s26, %s2122_s26, %s2123_s27  }
  0x52   :  { %2109 = dma.done.wait [#allocation4], 256  }
  0x53   :  { %2110 = vsyncadd [#allocation4], 4294967040 }
  0x54   :  { %2111 = dma.done.wait [#allocation6], 6144  }
  0x55   :  { %2112 = vsyncadd [#allocation6], 4294961152 }
  0x56   :  { %2113 = dma.done.wait [#allocation9], 7168  }
  0x57   :  { %2114 = vsyncadd [#allocation9], 4294960128 }
  0x58   :  { %2115 = dma.done.wait [#allocation12], 3072  }
  0x59   :  { %2116 = vsyncadd [#allocation12], 4294964224  ;;  %v2130_v1 = vmov 0.0   ;;  %v1833_v2 = vld [vmem:[#allocation7 + $0x78] sm:$0xff]   ;;  %v1835_v4 = vld [vmem:[#allocation7 + $0x70] sm:$0xff]   ;;  %vm2131_vm0 = vmmov 0  }
  0x5a   :  { %1778 = vmatprep.subr.bf16.mxu1 %v2130_v1  ;;  %v1834_v3 = vld [vmem:[#allocation7 + $0x38] sm:$0xff]   ;;  %1652 = vmatprep.subr.bf16.mxu0 %v1833_v2  ;;  %v1836_v5 = vld [vmem:[#allocation7 + $0x30] sm:$0xff]   ;;  %v1837_v6 = vld [vmem:[#allocation7 + $0x68] sm:$0xff]   ;;  %vm1022_vm1 = vcmask 1046528   ;;  %vm1079_vm2 = vcmask 1045504   ;;  %vm1238_vm3 = vcmask 1041409  }
  0x5b   :  { %1653 = vmatpush3.bf16.msra.mxu0 %v1834_v3  ;;  %v1838_v7 = vld [vmem:[#allocation7 + $0x28] sm:$0xff]   ;;  %v1839_v8 = vld [vmem:[#allocation7 + $0x60] sm:$0xff]   ;;  %v1841_v10 = vld [vmem:[#allocation7 + $0x58] sm:$0xff]   ;;  %1794 = vmatprep.mubr.msk.bf16.mxu1 %vm2131_vm0, %v2130_v1  ;;  %vm1240_vm4 = vcmask 1042434   ;;  %vm1242_vm5 = vcmask 1043459   ;;  %vm1244_vm6 = vcmask 1044484  }
  0x5c   :  { %1654 = vmatprep.subr.bf16.mxu0 %v1835_v4  ;;  %v1840_v9 = vld [vmem:[#allocation7 + $0x20] sm:$0xff]   ;;  %v1842_v11 = vld [vmem:[#allocation7 + $0x18] sm:$0xff]   ;;  %v1843_v12 = vld [vmem:[#allocation7 + $0x50] sm:$0xff]   ;;  %vm1246_vm7 = vcmask 1045509   ;;  %vm1248_vm8 = vcmask 1046534   ;;  %vm1250_vm9 = vcmask 1047559  }
  0x5d   :  { %v144_v13 = vld [vmem:[#allocation3 + $0x8] sm:$0xff]  ;;  %v1844_v15 = vld [vmem:[#allocation7 + $0x10] sm:$0xff]   ;;  %v1845_v16 = vld [vmem:[#allocation7 + $0x48] sm:$0xff]   ;;  %vm1539_vm10 = vcmask 7168  }
  0x5e   :  { %v146_v14 = vpack.c.bf16 %v144_v13, %v144_v13  ;;  %v1858_v17 = vld [vmem:[#allocation8 + $0x38] sm:$0xff]   ;;  %v1846_v18 = vld [vmem:[#allocation7 + $0x8] sm:$0xff]   ;;  %v1862_v19 = vld [vmem:[#allocation8 + $0x30] sm:$0xff]  }
  0x5f   :  { %1655 = vmatpush3.bf16.msra.mxu0 %v1836_v5  ;;  %1779 = vmatpush3.bf16.msra.mxu1 %v1858_v17  ;;  %v1847_v20 = vld [vmem:[#allocation7 + $0x40] sm:$0xff]   ;;  %v143_v22 = vld [vmem:[#allocation3] sm:$0xff]  ;;  %v1851_v23 = vld [vmem:[#allocation10 + $0xac] ss:$12 sps:$4 sm:$0xff]  }
  0x60   :  { %1656 = vmatprep.subr.bf16.mxu0 %v1837_v6  ;;  %314 = vmatprep.mubr.bf16.mxu0 %v146_v14  ;;  %v1848_v21 = vld [vmem:[#allocation7] sm:$0xff]   ;;  %v1866_v24 = vld [vmem:[#allocation8 + $0x28] sm:$0xff]   ;;  %v145_v26 = vpack.c.bf16 %v143_v22, %v143_v22  ;;  %v1852_v28 = vld [vmem:[#allocation10 + $0x90] ss:$12 sps:$4 sm:$0xff]  }
  0x61   :  { %1780 = vmatprep.subr.bf16.mxu1 %v2130_v1  ;;  %v1849_v25 = vld [vmem:[#allocation10 + $0xa8] ss:$12 sps:$4 sm:$0xff]   ;;  %v1855_v30 = vld [vmem:[#allocation10 + $0x78] ss:$12 sps:$4 sm:$0xff]   ;;  %v1859_v32 = vld [vmem:[#allocation10 + $0x60] ss:$12 sps:$4 sm:$0xff]  }
  0x62   :  { %v1854_v27 = vld [vmem:[#allocation10 + $0x94] ss:$12 sps:$4 sm:$0xff]   ;;  %v1857_v29 = vld [vmem:[#allocation10 + $0x7c] ss:$12 sps:$4 sm:$0xff]   ;;  %v1861_v31 = vld [vmem:[#allocation10 + $0x64] ss:$12 sps:$4 sm:$0xff]  }
  0x63   :  { %1657 = vmatpush3.bf16.msra.mxu0 %v1838_v7  ;;  %1781 = vmatpush3.bf16.msra.mxu1 %v1862_v19  ;;  %v1865_v33 = vld [vmem:[#allocation10 + $0x4c] ss:$12 sps:$4 sm:$0xff]   ;;  %v1863_v34 = vld [vmem:[#allocation10 + $0x48] ss:$12 sps:$4 sm:$0xff]   ;;  %v1867_v36 = vld [vmem:[#allocation10 + $0x30] ss:$12 sps:$4 sm:$0xff]  }
  0x64   :  { %1658 = vmatprep.subr.bf16.mxu0 %v1839_v8  ;;  %1782 = vmatprep.subr.bf16.mxu1 %v2130_v1  ;;  %v1869_v35 = vld [vmem:[#allocation10 + $0x34] ss:$12 sps:$4 sm:$0xff]   ;;  %v1873_v38 = vld [vmem:[#allocation10 + $0x1c] ss:$12 sps:$4 sm:$0xff]   ;;  %v1871_v39 = vld [vmem:[#allocation10 + $0x18] ss:$12 sps:$4 sm:$0xff]  }
  0x65   :  { %v1870_v37 = vld [vmem:[#allocation8 + $0x20] sm:$0xff]   ;;  %v1874_v40 = vld [vmem:[#allocation8 + $0x18] sm:$0xff]   ;;  %v1878_v43 = vld [vmem:[#allocation8 + $0x10] sm:$0xff]  }
  0x66   :  { %v1875_v41 = vld [vmem:[#allocation10] ss:$12 sps:$4 sm:$0xff]   ;;  %v1877_v42 = vld [vmem:[#allocation10 + $0x4] ss:$12 sps:$4 sm:$0xff]   ;;  %v1879_v45 = vld [vmem:[#allocation10 + $0x168] ss:$12 sps:$4 sm:$0xff]  }
  0x67   :  { %1659 = vmatpush3.bf16.msra.mxu0 %v1840_v9  ;;  %1783 = vmatpush3.bf16.msra.mxu1 %v1866_v24  ;;  %v1881_v44 = vld [vmem:[#allocation10 + $0x16c] ss:$12 sps:$4 sm:$0xff]   ;;  %v1885_v47 = vld [vmem:[#allocation10 + $0x154] ss:$12 sps:$4 sm:$0xff]   ;;  %v1883_v48 = vld [vmem:[#allocation10 + $0x150] ss:$12 sps:$4 sm:$0xff]  }
  0x68   :  { %1660 = vmatprep.subr.bf16.mxu0 %v1841_v10  ;;  %1784 = vmatprep.subr.bf16.mxu1 %v2130_v1  ;;  %v1882_v46 = vld [vmem:[#allocation8 + $0x8] sm:$0xff]   ;;  %v1886_v49 = vld [vmem:[#allocation8] sm:$0xff]   ;;  %v1890_v51 = vld [vmem:[#allocation10 + $0x170] ss:$12 sps:$4 sm:$0xff]  }
  0x69   :  { %v1889_v50 = vld [vmem:[#allocation10 + $0x13c] ss:$12 sps:$4 sm:$0xff]   ;;  %v1887_v52 = vld [vmem:[#allocation10 + $0x138] ss:$12 sps:$4 sm:$0xff]   ;;  %v1892_v53 = vld [vmem:[#allocation10 + $0x120] ss:$12 sps:$4 sm:$0xff]  }
  0x6a   :  { %v1894_v54 = vld [vmem:[#allocation10 + $0x124] ss:$12 sps:$4 sm:$0xff]   ;;  %v1897_v55 = vld [vmem:[#allocation10 + $0x108] ss:$12 sps:$4 sm:$0xff]   ;;  %v1899_v56 = vld [vmem:[#allocation10 + $0x10c] ss:$12 sps:$4 sm:$0xff]  }
  0x6b   :  { %1661 = vmatpush3.bf16.msra.mxu0 %v1842_v11  ;;  %1785 = vmatpush3.bf16.msra.mxu1 %v1870_v37  ;;  %v1902_v57 = vld [vmem:[#allocation10 + $0xf0] ss:$12 sps:$4 sm:$0xff]   ;;  %v1904_v58 = vld [vmem:[#allocation10 + $0xf4] ss:$12 sps:$4 sm:$0xff]   ;;  %v1907_v59 = vld [vmem:[#allocation10 + $0xd8] ss:$12 sps:$4 sm:$0xff]  }
  0x6c   :  { %1662 = vmatprep.subr.bf16.mxu0 %v1843_v12  ;;  %1786 = vmatprep.subr.bf16.mxu1 %v2130_v1  ;;  %v1909_v60 = vld [vmem:[#allocation10 + $0xdc] ss:$12 sps:$4 sm:$0xff]   ;;  %v1912_v61 = vld [vmem:[#allocation10 + $0xc0] ss:$12 sps:$4 sm:$0xff]   ;;  %v1914_v62 = vld [vmem:[#allocation10 + $0xc4] ss:$12 sps:$4 sm:$0xff]  }
  0x6d   :  { %v437_v63 = vld [vmem:[#allocation5 + $0x8] sm:$0xff]  ;;  %v439_v0 = vld [vmem:[#allocation5 + $0x18] sm:$0xff]  ;;  %v436_v3 = vld [vmem:[#allocation5] sm:$0xff] }
  0x6e   :  { %v2253_v2 = vpack.c.bf16 %v439_v0, %v437_v63  ;;  %v438_v4 = vld [vmem:[#allocation5 + $0x10] sm:$0xff]  ;;  %v441_v6 = vld [vmem:[#allocation5 + $0x28] sm:$0xff]  ;;  %v443_v7 = vld [vmem:[#allocation5 + $0x38] sm:$0xff] }
  0x6f   :  { %1663 = vmatpush3.bf16.msra.mxu0 %v1844_v15  ;;  %1787 = vmatpush3.bf16.msra.mxu1 %v1874_v40  ;;  %v2255_v5 = vpack.c.bf16 %v438_v4, %v436_v3  ;;  %v2259_v8 = vpack.c.bf16 %v443_v7, %v441_v6  ;;  %v440_v9 = vld [vmem:[#allocation5 + $0x20] sm:$0xff]  ;;  %v442_v10 = vld [vmem:[#allocation5 + $0x30] sm:$0xff]  ;;  %v445_v12 = vld [vmem:[#allocation5 + $0x48] sm:$0xff] }
  0x70   :  { %1664 = vmatprep.subr.bf16.mxu0 %v1845_v16  ;;  %1788 = vmatprep.subr.bf16.mxu1 %v2130_v1  ;;  %v2261_v11 = vpack.c.bf16 %v442_v10, %v440_v9  ;;  %v447_v13 = vld [vmem:[#allocation5 + $0x58] sm:$0xff]  ;;  %v444_v14 = vld [vmem:[#allocation5 + $0x40] sm:$0xff]  ;;  %v446_v16 = vld [vmem:[#allocation5 + $0x50] sm:$0xff] }
  0x71   :  { %v2265_v15 = vpack.c.bf16 %v447_v13, %v445_v12  ;;  %v2268_v17 = vpack.c.bf16 %v446_v16, %v444_v14  ;;  %v451_v19 = vld [vmem:[#allocation5 + $0x78] sm:$0xff]  ;;  %v450_v22 = vld [vmem:[#allocation5 + $0x70] sm:$0xff]  ;;  %v453_v24 = vld [vmem:[#allocation5 + $0x88] sm:$0xff] }
  0x72   :  { %v463_v37 = vld [vmem:[#allocation5 + $0xd8] sm:$0xff]  ;;  %v462_v40 = vld [vmem:[#allocation5 + $0xd0] sm:$0xff]  ;;  %v1917_v7 = vld [vmem:[#allocation10 + $0xe0] ss:$12 sps:$4 sm:$0xff]  }
  0x73   :  { %1665 = vmatpush3.bf16.msra.mxu0 %v1846_v18  ;;  %1789 = vmatpush3.bf16.msra.mxu1 %v1878_v43  ;;  %v449_v18 = vld [vmem:[#allocation5 + $0x68] sm:$0xff]  ;;  %v467_v43 = vld [vmem:[#allocation5 + $0xf8] sm:$0xff] }
  0x74   :  { %1666 = vmatprep.subr.bf16.mxu0 %v1847_v20  ;;  %1790 = vmatprep.subr.bf16.mxu1 %v2130_v1  ;;  %v448_v20 = vld [vmem:[#allocation5 + $0x60] sm:$0xff]  ;;  %v1906_v63 = vld [vmem:[#allocation10 + $0x68] ss:$12 sps:$4 sm:$0xff]   ;;  %v1910_v0 = vld [vmem:[#allocation10 + $0x110] ss:$12 sps:$4 sm:$0xff]  }
  0x75   :  { %v1911_v3 = vld [vmem:[#allocation10 + $0x50] ss:$12 sps:$4 sm:$0xff]   ;;  %v1915_v4 = vld [vmem:[#allocation10 + $0xf8] ss:$12 sps:$4 sm:$0xff]   ;;  %v1919_v9 = vld [vmem:[#allocation10 + $0xc8] ss:$12 sps:$4 sm:$0xff]  }
  0x76   :  { %v1916_v6 = vld [vmem:[#allocation10 + $0x38] ss:$12 sps:$4 sm:$0xff]   ;;  %v1920_v10 = vld [vmem:[#allocation10 + $0x8] ss:$12 sps:$4 sm:$0xff]  }
  0x77   :  { %1667 = vmatpush3.bf16.msra.mxu0 %v1848_v21  ;;  %1791 = vmatpush3.bf16.msra.mxu1 %v1882_v46  ;;  %v2271_v21 = vpack.c.bf16 %v451_v19, %v449_v18  ;;  %v466_v46 = vld [vmem:[#allocation5 + $0xf0] sm:$0xff] }
  0x78   :  { %804 = vmatprep.subr.bf16.mxu0 %v1851_v23  ;;  %1792 = vmatprep.subr.bf16.mxu1 %v2130_v1  ;;  %v2274_v23 = vpack.c.bf16 %v450_v22, %v448_v20 }
  0x7a   :  { %315 = vmatmul.mubr.bf16.vlgmr.msra.gmra.mxu0 %v145_v26  ;;  %v452_v26 = vld [vmem:[#allocation5 + $0x80] sm:$0xff] }
  0x7b   :  { %805 = vmatpush1.bf16.msra.mxu0 %v1849_v25  ;;  %1793 = vmatpush3.bf16.msra.mxu1 %v1886_v49  ;;  %v455_v25 = vld [vmem:[#allocation5 + $0x98] sm:$0xff]  ;;  %v1549_v49 = vld [vmem:[%s2396_s3] ss:$0 sm:$0xff] }
  0x7c   :  { %806 = vmatprep.subr.bf16.mxu0 %v1854_v27  ;;  %1683 = vmatprep.subr.bf16.mxu1 %v1890_v51  ;;  %v2277_v27 = vpack.c.bf16 %v455_v25, %v453_v24 }
  0x7d   :  { %836 = vmatprep.mubr.bf16.mxu0 %v2253_v2 }
  0x7f   :  { %807 = vmatpush1.bf16.msra.mxu0 %v1852_v28  ;;  %v454_v28 = vld [vmem:[#allocation5 + $0x90] sm:$0xff] }
  0x80   :  { %808 = vmatprep.subr.bf16.mxu0 %v1857_v29  ;;  %v2280_v29 = vpack.c.bf16 %v454_v28, %v452_v26 }
  0x83   :  { %809 = vmatpush1.bf16.msra.mxu0 %v1855_v30  ;;  %v457_v30 = vld [vmem:[#allocation5 + $0xa8] sm:$0xff] }
  0x84   :  { %810 = vmatprep.subr.bf16.mxu0 %v1861_v31  ;;  %v459_v31 = vld [vmem:[#allocation5 + $0xb8] sm:$0xff] }
  0x87   :  { %811 = vmatpush1.bf16.msra.mxu0 %v1859_v32  ;;  %v456_v32 = vld [vmem:[#allocation5 + $0xa0] sm:$0xff] }
  0x88   :  { %812 = vmatprep.subr.bf16.mxu0 %v1865_v33  ;;  %v2283_v33 = vpack.c.bf16 %v459_v31, %v457_v30 }
  0x8b   :  { %813 = vmatpush1.bf16.msra.mxu0 %v1863_v34  ;;  %v458_v34 = vld [vmem:[#allocation5 + $0xb0] sm:$0xff] }
  0x8c   :  { %814 = vmatprep.subr.bf16.mxu0 %v1869_v35  ;;  %v2286_v35 = vpack.c.bf16 %v458_v34, %v456_v32 }
  0x8f   :  { %815 = vmatpush1.bf16.msra.mxu0 %v1867_v36  ;;  %v461_v36 = vld [vmem:[#allocation5 + $0xc8] sm:$0xff] }
  0x90   :  { %816 = vmatprep.subr.bf16.mxu0 %v1873_v38  ;;  %v460_v38 = vld [vmem:[#allocation5 + $0xc0] sm:$0xff] }
  0x93   :  { %817 = vmatpush1.bf16.msra.mxu0 %v1871_v39  ;;  %v2289_v39 = vpack.c.bf16 %v463_v37, %v461_v36 }
  0x94   :  { %818 = vmatprep.subr.bf16.mxu0 %v1877_v42  ;;  %v465_v42 = vld [vmem:[#allocation5 + $0xe8] sm:$0xff] }
  0x97   :  { %819 = vmatpush1.bf16.msra.mxu0 %v1875_v41  ;;  %v2292_v41 = vpack.c.bf16 %v462_v40, %v460_v38 }
  0x98   :  { %820 = vmatprep.subr.bf16.mxu0 %v1881_v44  ;;  %v464_v44 = vld [vmem:[#allocation5 + $0xe0] sm:$0xff] }
  0x9b   :  { %821 = vmatpush2.bf16.msra.mxu0 %v1879_v45  ;;  %v483_v45 = vpack.c.bf16 %v467_v43, %v465_v42 }
  0x9c   :  { %822 = vmatprep.subr.bf16.mxu0 %v1885_v47  ;;  %v482_v47 = vpack.c.bf16 %v466_v46, %v464_v44 }
  0x9f   :  { %823 = vmatpush2.bf16.msra.mxu0 %v1883_v48 }
  0xa0   :  { %824 = vmatprep.subr.bf16.mxu0 %v1889_v50 }
  0xa3   :  { %825 = vmatpush2.bf16.msra.mxu0 %v1887_v52 }
  0xa4   :  { %826 = vmatprep.subr.bf16.mxu0 %v1894_v54 }
  0xa7   :  { %827 = vmatpush2.bf16.msra.mxu0 %v1892_v53 }
  0xa8   :  { %828 = vmatprep.subr.bf16.mxu0 %v1899_v56  ;;  %v1891_v56 = vld [vmem:[#allocation10 + $0xb0] ss:$12 sps:$4 sm:$0xff]  }
  0xab   :  { %829 = vmatpush2.bf16.msra.mxu0 %v1897_v55 }
  0xac   :  { %830 = vmatprep.subr.bf16.mxu0 %v1904_v58  ;;  %v1895_v58 = vld [vmem:[#allocation10 + $0x158] ss:$12 sps:$4 sm:$0xff]  }
  0xaf   :  { %831 = vmatpush2.bf16.msra.mxu0 %v1902_v57 }
  0xb0   :  { %832 = vmatprep.subr.bf16.mxu0 %v1909_v60  ;;  %v1900_v60 = vld [vmem:[#allocation10 + $0x140] ss:$12 sps:$4 sm:$0xff]  }
  0xb3   :  { %833 = vmatpush2.bf16.msra.mxu0 %v1907_v59  ;;  %v1896_v59 = vld [vmem:[#allocation10 + $0x98] ss:$12 sps:$4 sm:$0xff]  }
  0xb4   :  { %834 = vmatprep.subr.bf16.mxu0 %v1914_v62  ;;  %v1905_v62 = vld [vmem:[#allocation10 + $0x128] ss:$12 sps:$4 sm:$0xff]  }
  0xb7   :  { %835 = vmatpush2.bf16.msra.mxu0 %v1912_v61  ;;  %v1901_v61 = vld [vmem:[#allocation10 + $0x80] ss:$12 sps:$4 sm:$0xff]  }
  0xba   :  { %837 = vmatmul.mubr.bf16.vlgmr.msra.gmra.mxu0 %v2255_v5 }
  0xbb   :  { %845 = vmatprep.mubr.bf16.mxu0 %v2259_v8 }
  0xc2   :  { %846 = vmatmul.mubr.bf16.gmra.mxu0 %v2261_v11 }
  0xc3   :  { %854 = vmatprep.mubr.bf16.mxu0 %v2265_v15 }
  0xca   :  { %855 = vmatmul.mubr.bf16.gmra.mxu0 %v2268_v17 }
  0xcb   :  { %863 = vmatprep.mubr.bf16.mxu0 %v2271_v21 }
  0xd2   :  { %864 = vmatmul.mubr.bf16.gmra.mxu0 %v2274_v23 }
  0xd3   :  { %872 = vmatprep.mubr.bf16.mxu0 %v2277_v27 }
  0xda   :  { %873 = vmatmul.mubr.bf16.gmra.mxu0 %v2280_v29 }
  0xdb   :  { %881 = vmatprep.mubr.bf16.mxu0 %v2283_v33 }
  0xe2   :  { %882 = vmatmul.mubr.bf16.gmra.mxu0 %v2286_v35 }
  0xe3   :  { %890 = vmatprep.mubr.bf16.mxu0 %v2289_v39 }
  0xea   :  { %891 = vmatmul.mubr.bf16.gmra.mxu0 %v2292_v41 }
  0xeb   :  { %899 = vmatprep.mubr.bf16.mxu0 %v483_v45 }
  0xf2   :  { %900 = vmatmul.mubr.bf16.gmra.mxu0 %v482_v47 }
 0x13a   :  { %v1668_v48 = vpop.f32.mrf.mxu0 }
 0x13c   :  { %v1669_v50 = vpop.f32.mrf.mxu0 }
 0x13d   :  { %v1670_v51 = vadd.f32 %v1669_v50, %v1668_v48 }
 0x13e   :  { %v1671_v52 = vpop.f32.mrf.mxu0 }
 0x13f   :  { %v317_v53 = vadd.f32 %v1670_v51, %v1549_v49 }
 0x140   :  { %v1672_v54 = vpop.f32.mrf.mxu0 }
 0x141   :  { %1945 = vtanh.f32 %v317_v53 }
 0x14e   :  { %v1946_v55 = vpop.eup %1945 }
 0x14f   :  { %v323_v57 = vpack.c.bf16 %v1946_v55, %v1946_v55 }
 0x151   :  { %1795 = vmatmul.mubr.bf16.vlgmr.msra.gmra.mxu1 %v323_v57 }
 0x152   :  { %1684 = vmatpush3.bf16.msra.mxu1 %v1891_v56  ;;  %941 = vmatprep.mubr.bf16.mxu1 %v2253_v2  ;;  %v1918_v2 = vld [vmem:[#allocation10 + $0x20] ss:$12 sps:$4 sm:$0xff]  }
 0x153   :  { %1685 = vmatprep.subr.bf16.mxu1 %v1895_v58 }
 0x156   :  { %1686 = vmatpush3.bf16.msra.mxu1 %v1896_v59 }
 0x157   :  { %1687 = vmatprep.subr.bf16.mxu1 %v1900_v60 }
 0x15a   :  { %1688 = vmatpush3.bf16.msra.mxu1 %v1901_v61 }
 0x15b   :  { %1689 = vmatprep.subr.bf16.mxu1 %v1905_v62 }
 0x15e   :  { %1690 = vmatpush3.bf16.msra.mxu1 %v1906_v63 }
 0x15f   :  { %1691 = vmatprep.subr.bf16.mxu1 %v1910_v0 }
 0x162   :  { %1692 = vmatpush3.bf16.msra.mxu1 %v1911_v3 }
 0x163   :  { %1693 = vmatprep.subr.bf16.mxu1 %v1915_v4 }
 0x166   :  { %1694 = vmatpush3.bf16.msra.mxu1 %v1916_v6 }
 0x167   :  { %1695 = vmatprep.subr.bf16.mxu1 %v1917_v7 }
 0x16a   :  { %1696 = vmatpush3.bf16.msra.mxu1 %v1918_v2 }
 0x16b   :  { %1697 = vmatprep.subr.bf16.mxu1 %v1919_v9 }
 0x16e   :  { %1698 = vmatpush3.bf16.msra.mxu1 %v1920_v10 }
 0x16f   :  { %1798 = vmatprep.subr.bf16.mxu1 %v2130_v1 }
 0x171   :  { %942 = vmatmul.mubr.bf16.vlgmr.msra.gmra.mxu1 %v2255_v5 }
 0x172   :  { %949 = vmatprep.mubr.bf16.mxu1 %v2259_v8 }
 0x179   :  { %950 = vmatmul.mubr.bf16.gmra.mxu1 %v2261_v11 }
 0x17a   :  { %957 = vmatprep.mubr.bf16.mxu1 %v2265_v15  ;;  %v838_v5 = vpop.f32.mrf.mxu0 }
 0x17c   :  { %v840_v8 = vpop.f32.mrf.mxu0 }
 0x17d   :  { %v1023_v12 = vrot.slane %v840_v8, 1  ;;  %v1921_v8 = vld [vmem:[#allocation11 + $0x38] sm:$0xff]  }
 0x17e   :  { %v842_v11 = vpop.f32.mrf.mxu0  ;;  %1799 = vmatpush3.bf16.msra.mxu1 %v1921_v8 }
 0x17f   :  { %1800 = vmatprep.subr.bf16.mxu1 %v2130_v1  ;;  %v1922_v11 = vld [vmem:[#allocation11 + $0x30] sm:$0xff]  }
 0x180   :  { %v843_v13 = vpop.f32.mrf.mxu0 }
 0x181   :  { %958 = vmatmul.mubr.bf16.gmra.mxu1 %v2268_v17  ;;  %v1024_v14 = vrot.slane %v843_v13, 1  ;;  %v1924_v13 = vld [vmem:[#allocation11 + $0x20] sm:$0xff]  }
 0x182   :  { %965 = vmatprep.mubr.bf16.mxu1 %v2271_v21  ;;  %v847_v15 = vpop.f32.mrf.mxu0  ;;  %1801 = vmatpush3.bf16.msra.mxu1 %v1922_v11 }
 0x183   :  { %v1025_v16 = vsel %vm1022_vm1, %v1023_v12, %v1024_v14  ;;  %1802 = vmatprep.subr.bf16.mxu1 %v2130_v1  ;;  %v1923_v12 = vld [vmem:[#allocation11 + $0x28] sm:$0xff]   ;;  %v1925_v14 = vld [vmem:[#allocation11 + $0x18] sm:$0xff]  }
 0x184   :  { %v2316_v17 = vadd.f32 %v1025_v16, %v838_v5  ;;  %v849_v18 = vpop.f32.mrf.mxu0  ;;  %v1927_v16 = vld [vmem:[#allocation11 + $0x8] sm:$0xff]  }
 0x185   :  { %v1026_v20 = vrot.slane %v849_v18, 1 }
 0x186   :  { %v851_v19 = vpop.f32.mrf.mxu0  ;;  %1803 = vmatpush3.bf16.msra.mxu1 %v1923_v12 }
 0x187   :  { %1804 = vmatprep.subr.bf16.mxu1 %v2130_v1 }
 0x188   :  { %v852_v21 = vpop.f32.mrf.mxu0 }
 0x189   :  { %966 = vmatmul.mubr.bf16.gmra.mxu1 %v2274_v23  ;;  %v1027_v22 = vrot.slane %v852_v21, 1 }
 0x18a   :  { %973 = vmatprep.mubr.bf16.mxu1 %v2277_v27  ;;  %v856_v23 = vpop.f32.mrf.mxu0  ;;  %1805 = vmatpush3.bf16.msra.mxu1 %v1924_v13 }
 0x18b   :  { %v1028_v24 = vsel %vm1022_vm1, %v1026_v20, %v1027_v22  ;;  %1806 = vmatprep.subr.bf16.mxu1 %v2130_v1  ;;  %v1928_v20 = vld [vmem:[#allocation11] sm:$0xff]  }
 0x18c   :  { %v2319_v25 = vadd.f32 %v1028_v24, %v847_v15  ;;  %v858_v26 = vpop.f32.mrf.mxu0  ;;  %v1926_v15 = vld [vmem:[#allocation11 + $0x10] sm:$0xff]   ;;  %v1930_v24 = vld [vmem:[#allocation13 + $0x38] sm:$0xff]  }
 0x18e   :  { %v860_v27 = vpop.f32.mrf.mxu0  ;;  %1807 = vmatpush3.bf16.msra.mxu1 %v1925_v14 }
 0x18f   :  { %1808 = vmatprep.subr.bf16.mxu1 %v2130_v1  ;;  %v1932_v27 = vld [vmem:[#allocation13 + $0x30] sm:$0xff]  }
 0x190   :  { %v861_v28 = vpop.f32.mrf.mxu0 }
 0x191   :  { %974 = vmatmul.mubr.bf16.gmra.mxu1 %v2280_v29  ;;  %v1029_v29 = vrot.slane %v858_v26, 1  ;;  %v1030_v30 = vrot.slane %v861_v28, 1  ;;  %v1931_v26 = vld [vmem:[#allocation13 + $0x70] sm:$0xff]   ;;  %v1933_v28 = vld [vmem:[#allocation13 + $0x68] sm:$0xff]  }
 0x192   :  { %981 = vmatprep.mubr.bf16.mxu1 %v2283_v33  ;;  %v865_v31 = vpop.f32.mrf.mxu0  ;;  %1809 = vmatpush3.bf16.msra.mxu1 %v1926_v15 }
 0x193   :  { %v1031_v32 = vsel %vm1022_vm1, %v1029_v29, %v1030_v30  ;;  %1810 = vmatprep.subr.bf16.mxu1 %v2130_v1  ;;  %v1934_v29 = vld [vmem:[#allocation13 + $0x28] sm:$0xff]   ;;  %v1935_v30 = vld [vmem:[#allocation13 + $0x60] sm:$0xff]  }
 0x194   :  { %v2322_v33 = vadd.f32 %v1031_v32, %v856_v23  ;;  %v867_v34 = vpop.f32.mrf.mxu0  ;;  %v1929_v23 = vld [vmem:[#allocation13 + $0x78] sm:$0xff]  }
 0x195   :  { %v1032_v37 = vrot.slane %v867_v34, 1  ;;  %1756 = vmatprep.subr.bf16.mxu0 %v1929_v23  ;;  %v1937_v32 = vld [vmem:[#allocation13 + $0x58] sm:$0xff]   ;;  %v1939_v34 = vld [vmem:[#allocation13 + $0x50] sm:$0xff]  }
 0x196   :  { %1811 = vmatpush3.bf16.msra.mxu1 %v1927_v16  ;;  %1757 = vmatpush3.bf16.msra.mxu0 %v1930_v24 }
 0x197   :  { %1812 = vmatprep.subr.bf16.mxu1 %v2130_v1  ;;  %1758 = vmatprep.subr.bf16.mxu0 %v1931_v26 }
 0x199   :  { %982 = vmatmul.mubr.bf16.gmra.mxu1 %v2286_v35  ;;  %v869_v35 = vpop.f32.mrf.mxu0 }
 0x19a   :  { %989 = vmatprep.mubr.bf16.mxu1 %v2289_v39  ;;  %1813 = vmatpush3.bf16.msra.mxu1 %v1928_v20  ;;  %v1940_v35 = vld [vmem:[#allocation13 + $0x10] sm:$0xff]  }
 0x19b   :  { %v870_v36 = vpop.f32.mrf.mxu0  ;;  %1759 = vmatpush3.bf16.msra.mxu0 %v1932_v27 }
 0x19c   :  { %v1033_v38 = vrot.slane %v870_v36, 1  ;;  %1760 = vmatprep.subr.bf16.mxu0 %v1933_v28 }
 0x19d   :  { %v874_v39 = vpop.f32.mrf.mxu0 }
 0x19e   :  { %v1034_v40 = vsel %vm1022_vm1, %v1032_v37, %v1033_v38 }
 0x19f   :  { %v876_v42 = vpop.f32.mrf.mxu0  ;;  %1761 = vmatpush3.bf16.msra.mxu0 %v1934_v29 }
 0x1a0   :  { %1762 = vmatprep.subr.bf16.mxu0 %v1935_v30 }
 0x1a1   :  { %990 = vmatmul.mubr.bf16.gmra.mxu1 %v2292_v41  ;;  %v2325_v41 = vadd.f32 %v1034_v40, %v865_v31  ;;  %v878_v43 = vpop.f32.mrf.mxu0  ;;  %v1936_v31 = vld [vmem:[#allocation13 + $0x20] sm:$0xff]  }
 0x1a2   :  { %997 = vmatprep.mubr.bf16.mxu1 %v483_v45  ;;  %v1035_v45 = vrot.slane %v876_v42, 1 }
 0x1a3   :  { %v879_v44 = vpop.f32.mrf.mxu0  ;;  %1763 = vmatpush3.bf16.msra.mxu0 %v1936_v31 }
 0x1a4   :  { %v1036_v46 = vrot.slane %v879_v44, 1  ;;  %1764 = vmatprep.subr.bf16.mxu0 %v1937_v32 }
 0x1a6   :  { %v1037_v48 = vsel %vm1022_vm1, %v1035_v45, %v1036_v46 }
 0x1a7   :  { %v2328_v49 = vadd.f32 %v1037_v48, %v874_v39  ;;  %v2352_v48 = vld [vmem:[%s2400_s7] ss:$0 sm:$0xff] }
 0x1a9   :  { %998 = vmatmul.mubr.bf16.gmra.mxu1 %v482_v47  ;;  %v883_v47 = vpop.f32.mrf.mxu0 }
 0x1aa   :  { %1814 = vmatprep.mubr.msk.bf16.mxu1 %vm2131_vm0, %v2130_v1  ;;  %v1938_v1 = vld [vmem:[#allocation13 + $0x18] sm:$0xff]  }
 0x1ab   :  { %v885_v50 = vpop.f32.mrf.mxu0  ;;  %1765 = vmatpush3.bf16.msra.mxu0 %v1938_v1 }
 0x1ac   :  { %v1038_v53 = vrot.slane %v885_v50, 1  ;;  %1766 = vmatprep.subr.bf16.mxu0 %v1939_v34 }
 0x1ad   :  { %v887_v51 = vpop.f32.mrf.mxu0 }
 0x1af   :  { %v888_v52 = vpop.f32.mrf.mxu0  ;;  %1767 = vmatpush3.bf16.msra.mxu0 %v1940_v35 }
 0x1b0   :  { %v1039_v54 = vrot.slane %v888_v52, 1 }
 0x1b1   :  { %v892_v55 = vpop.f32.mrf.mxu0 }
 0x1b2   :  { %v1040_v56 = vsel %vm1022_vm1, %v1038_v53, %v1039_v54 }
 0x1b3   :  { %v2331_v57 = vadd.f32 %v1040_v56, %v883_v47  ;;  %v894_v58 = vpop.f32.mrf.mxu0 }
 0x1b4   :  { %v1041_v61 = vrot.slane %v894_v58, 1 }
 0x1b5   :  { %v896_v59 = vpop.f32.mrf.mxu0 }
 0x1b7   :  { %v897_v60 = vpop.f32.mrf.mxu0 }
 0x1b8   :  { %v1042_v62 = vrot.slane %v897_v60, 1 }
 0x1b9   :  { %v901_v63 = vpop.f32.mrf.mxu0 }
 0x1ba   :  { %v1043_v0 = vsel %vm1022_vm1, %v1041_v61, %v1042_v62 }
 0x1bb   :  { %v2334_v3 = vadd.f32 %v1043_v0, %v892_v55  ;;  %v903_v4 = vpop.f32.mrf.mxu0 }
 0x1bc   :  { %v1044_v2 = vrot.slane %v903_v4, 1 }
 0x1bd   :  { %v905_v6 = vpop.f32.mrf.mxu0 }
 0x1bf   :  { %v906_v7 = vpop.f32.mrf.mxu0 }
 0x1c0   :  { %v1045_v9 = vrot.slane %v906_v7, 1 }
 0x1c2   :  { %v1046_v10 = vsel %vm1022_vm1, %v1044_v2, %v1045_v9 }
 0x1c3   :  { %v2337_v5 = vadd.f32 %v1046_v10, %v901_v63 }
 0x211   :  { %v2345_v18 = vpop.f32.mrf.mxu1 }
 0x213   :  { %v1796_v19 = vpop.f32.mrf.mxu1 }
 0x215   :  { %v432_v21 = vpop.f32.mrf.mxu1 }
 0x217   :  { %v1797_v22 = vpop.f32.mrf.mxu1 }
 0x231   :  { %v1699_v36 = vpop.f32.mrf.mxu1 }
 0x233   :  { %v1700_v37 = vpop.f32.mrf.mxu1 }
 0x234   :  { %v1701_v39 = vadd.f32 %v1700_v37, %v1699_v36 }
 0x235   :  { %v1702_v38 = vpop.f32.mrf.mxu1 }
 0x236   :  { %v1080_v44 = vrot.slane %v1701_v39, 2 }
 0x237   :  { %v1703_v40 = vpop.f32.mrf.mxu1 }
 0x238   :  { %v1704_v42 = vadd.f32 %v1703_v40, %v1702_v38 }
 0x239   :  { %v1705_v43 = vpop.f32.mrf.mxu1 }
 0x23a   :  { %v1081_v45 = vrot.slane %v1704_v42, 2 }
 0x23b   :  { %v1706_v46 = vpop.f32.mrf.mxu1 }
 0x23c   :  { %v1082_v47 = vsel %vm1079_vm2, %v1080_v44, %v1081_v45  ;;  %v1707_v52 = vadd.f32 %v1706_v46, %v1705_v43 }
 0x23d   :  { %v1112_v50 = vadd.f32 %v1082_v47, %v2316_v17  ;;  %v1708_v51 = vpop.f32.mrf.mxu1 }
 0x23e   :  { %v1083_v58 = vrot.slane %v1707_v52, 2 }
 0x23f   :  { %v1127_v53 = vadd.f32 %v2352_v48, %v1112_v50  ;;  %v1709_v54 = vpop.f32.mrf.mxu1 }
 0x240   :  { %v1710_v55 = vadd.f32 %v1709_v54, %v1708_v51 }
 0x241   :  { %1947 = vtanh.f32 %v1127_v53  ;;  %v1711_v56 = vpop.f32.mrf.mxu1 }
 0x242   :  { %v1084_v59 = vrot.slane %v1710_v55, 2 }
 0x243   :  { %v1712_v60 = vpop.f32.mrf.mxu1 }
 0x244   :  { %v1085_v61 = vsel %vm1079_vm2, %v1083_v58, %v1084_v59  ;;  %v1713_v0 = vadd.f32 %v1712_v60, %v1711_v56 }
 0x245   :  { %v1113_v62 = vadd.f32 %v1085_v61, %v2319_v25  ;;  %v1714_v63 = vpop.f32.mrf.mxu1 }
 0x246   :  { %v1086_v2 = vrot.slane %v1713_v0, 2 }
 0x247   :  { %v1128_v4 = vadd.f32 %v2352_v48, %v1113_v62  ;;  %v1715_v17 = vpop.f32.mrf.mxu1 }
 0x248   :  { %v1716_v6 = vadd.f32 %v1715_v17, %v1714_v63 }
 0x249   :  { %1949 = vtanh.f32 %v1128_v4  ;;  %v1717_v7 = vpop.f32.mrf.mxu1 }
 0x24a   :  { %v1087_v9 = vrot.slane %v1716_v6, 2 }
 0x24b   :  { %v1718_v10 = vpop.f32.mrf.mxu1 }
 0x24c   :  { %v1088_v8 = vsel %vm1079_vm2, %v1086_v2, %v1087_v9  ;;  %v1719_v14 = vadd.f32 %v1718_v10, %v1717_v7 }
 0x24d   :  { %v1114_v11 = vadd.f32 %v1088_v8, %v2322_v33  ;;  %v1720_v12 = vpop.f32.mrf.mxu1 }
 0x24e   :  { %v1948_v13 = vpop.eup %1947  ;;  %v1089_v22 = vrot.slane %v1719_v14, 2 }
 0x24f   :  { %v1143_v15 = vrot.slane %v1948_v13, 4  ;;  %v1129_v25 = vadd.f32 %v2352_v48, %v1114_v11  ;;  %v1721_v16 = vpop.f32.mrf.mxu1 }
 0x250   :  { %v1722_v19 = vadd.f32 %v1721_v16, %v1720_v12 }
 0x251   :  { %v1144_v20 = vmax.f32 %v1948_v13, %v1143_v15  ;;  %1951 = vtanh.f32 %v1129_v25  ;;  %v1723_v21 = vpop.f32.mrf.mxu1 }
 0x252   :  { %v1090_v23 = vrot.slane %v1722_v19, 2 }
 0x253   :  { %v1145_v24 = vrot.slane %v1144_v20, 2  ;;  %v1724_v26 = vpop.f32.mrf.mxu1 }
 0x254   :  { %v1091_v27 = vsel %vm1079_vm2, %v1089_v22, %v1090_v23  ;;  %v1725_v31 = vadd.f32 %v1724_v26, %v1723_v21 }
 0x255   :  { %v1146_v28 = vmax.f32 %v1144_v20, %v1145_v24  ;;  %v1115_v33 = vadd.f32 %v1091_v27, %v2325_v41  ;;  %v1726_v29 = vpop.f32.mrf.mxu1 }
 0x256   :  { %v1950_v30 = vpop.eup %1949  ;;  %v1092_v39 = vrot.slane %v1725_v31, 2 }
 0x257   :  { %v1149_v32 = vrot.slane %v1950_v30, 4  ;;  %v1130_v1 = vadd.f32 %v2352_v48, %v1115_v33  ;;  %v1727_v34 = vpop.f32.mrf.mxu1  ;;  %v1147_v36 = vrot.slane %v1146_v28, 1 }
 0x258   :  { %v1728_v35 = vadd.f32 %v1727_v34, %v1726_v29 }
 0x259   :  { %v1150_v37 = vmax.f32 %v1950_v30, %v1149_v32  ;;  %1953 = vtanh.f32 %v1130_v1  ;;  %v1729_v38 = vpop.f32.mrf.mxu1  ;;  %v1148_v45 = vmax.f32 %v1146_v28, %v1147_v36 }
 0x25a   :  { %v1093_v40 = vrot.slane %v1728_v35, 2 }
 0x25b   :  { %v1151_v42 = vrot.slane %v1150_v37, 2  ;;  %v1730_v43 = vpop.f32.mrf.mxu1  ;;  %v1191_v58 = vpack.c.bf16 %v1148_v45, %v1148_v45 }
 0x25c   :  { %v1094_v44 = vsel %vm1079_vm2, %v1092_v39, %v1093_v40  ;;  %v1731_v51 = vadd.f32 %v1730_v43, %v1729_v38 }
 0x25d   :  { %v1152_v41 = vmax.f32 %v1150_v37, %v1151_v42  ;;  %v1116_v46 = vadd.f32 %v1094_v44, %v2328_v49  ;;  %v1732_v47 = vpop.f32.mrf.mxu1  ;;  %v1230_v6 = vunpack.c.l.b16 %v1191_v58 }
 0x25e   :  { %v1952_v50 = vpop.eup %1951  ;;  %v1095_v62 = vrot.slane %v1731_v51, 2 }
 0x25f   :  { %v1153_v52 = vrot.slane %v1152_v41, 1  ;;  %v1155_v53 = vrot.slane %v1952_v50, 4  ;;  %v1131_v54 = vadd.f32 %v2352_v48, %v1116_v46  ;;  %v1733_v55 = vpop.f32.mrf.mxu1 }
 0x260   :  { %v1734_v56 = vadd.f32 %v1733_v55, %v1732_v47 }
 0x261   :  { %v1154_v59 = vmax.f32 %v1152_v41, %v1153_v52  ;;  %v1156_v60 = vmax.f32 %v1952_v50, %v1155_v53  ;;  %1955 = vtanh.f32 %v1131_v54  ;;  %v1735_v61 = vpop.f32.mrf.mxu1 }
 0x262   :  { %v1096_v63 = vrot.slane %v1734_v56, 2 }
 0x263   :  { %v1192_v0 = vpack.c.bf16 %v1154_v59, %v1154_v59  ;;  %v1157_v4 = vrot.slane %v1156_v60, 2  ;;  %v1736_v17 = vpop.f32.mrf.mxu1 }
 0x264   :  { %v1097_v49 = vsel %vm1079_vm2, %v1095_v62, %v1096_v63  ;;  %v1737_v11 = vadd.f32 %v1736_v17, %v1735_v61 }
 0x265   :  { %v1231_v7 = vunpack.c.l.b16 %v1192_v0  ;;  %v1158_v2 = vmax.f32 %v1156_v60, %v1157_v4  ;;  %v1117_v9 = vadd.f32 %v1097_v49, %v2331_v57  ;;  %v1738_v10 = vpop.f32.mrf.mxu1 }
 0x266   :  { %v1954_v8 = vpop.eup %1953  ;;  %v1098_v22 = vrot.slane %v1737_v11, 2 }
 0x267   :  { %v1159_v12 = vrot.slane %v1158_v2, 1  ;;  %v1161_v13 = vrot.slane %v1954_v8, 4  ;;  %v1132_v14 = vadd.f32 %v2352_v48, %v1117_v9  ;;  %v1739_v15 = vpop.f32.mrf.mxu1  ;;  %v1239_v25 = vsel %vm1238_vm3, %v1231_v7, %v1230_v6 }
 0x268   :  { %v1740_v16 = vadd.f32 %v1739_v15, %v1738_v10 }
 0x269   :  { %v1160_v19 = vmax.f32 %v1158_v2, %v1159_v12  ;;  %v1162_v20 = vmax.f32 %v1954_v8, %v1161_v13  ;;  %1957 = vtanh.f32 %v1132_v14  ;;  %v1741_v21 = vpop.f32.mrf.mxu1 }
 0x26a   :  { %v1099_v23 = vrot.slane %v1740_v16, 2 }
 0x26b   :  { %v1193_v24 = vpack.c.bf16 %v1160_v19, %v1160_v19  ;;  %v1163_v26 = vrot.slane %v1162_v20, 2  ;;  %v1742_v27 = vpop.f32.mrf.mxu1 }
 0x26c   :  { %v1100_v57 = vsel %vm1079_vm2, %v1098_v22, %v1099_v23  ;;  %v1743_v32 = vadd.f32 %v1742_v27, %v1741_v21  ;;  %v1942_v27 = vld [vmem:[#allocation13 + $0x8] sm:$0xff]  }
 0x26d   :  { %v1164_v28 = vmax.f32 %v1162_v20, %v1163_v26  ;;  %v1118_v33 = vadd.f32 %v1100_v57, %v2334_v3  ;;  %v1744_v29 = vpop.f32.mrf.mxu1  ;;  %v1232_v30 = vunpack.c.l.b16 %v1193_v24  ;;  %v1941_v26 = vld [vmem:[#allocation13 + $0x48] sm:$0xff]   ;;  %v1943_v57 = vld [vmem:[#allocation13 + $0x40] sm:$0xff]  }
 0x26e   :  { %v1956_v31 = vpop.eup %1955  ;;  %v1101_v42 = vrot.slane %v1743_v32, 2  ;;  %1768 = vmatprep.subr.bf16.mxu0 %v1941_v26 }
 0x26f   :  { %v1165_v1 = vrot.slane %v1164_v28, 1  ;;  %v1167_v34 = vrot.slane %v1956_v31, 4  ;;  %v1133_v35 = vadd.f32 %v2352_v48, %v1118_v33  ;;  %v1745_v36 = vpop.f32.mrf.mxu1  ;;  %v1241_v37 = vsel %vm1240_vm4, %v1232_v30, %v1239_v25  ;;  %1769 = vmatpush3.bf16.msra.mxu0 %v1942_v27  ;;  %v1566_v33 = vld [vmem:[%s2398_s5] ss:$0 sm:$0xff] }
 0x270   :  { %v1746_v38 = vadd.f32 %v1745_v36, %v1744_v29  ;;  %1770 = vmatprep.subr.bf16.mxu0 %v1943_v57  ;;  %v430_v29 = vadd.f32 %v1566_v33, %v2345_v18  ;;  %v1624_v30 = vld [vmem:[%s2402_s9] ss:$0 sm:$0xff] }
 0x271   :  { %v1168_v39 = vmax.f32 %v1956_v31, %v1167_v34  ;;  %1959 = vtanh.f32 %v1133_v35  ;;  %v1166_v40 = vmax.f32 %v1164_v28, %v1165_v1  ;;  %v1944_v28 = vld [vmem:[#allocation13] sm:$0xff]   ;;  %v1633_v18 = vld [vmem:[%s2404_s11] ss:$0 sm:$0xff] }
 0x272   :  { %v1102_v43 = vrot.slane %v1746_v38, 2 }
 0x273   :  { %v1169_v44 = vrot.slane %v1168_v39, 2  ;;  %v1194_v45 = vpack.c.bf16 %v1166_v40, %v1166_v40  ;;  %1771 = vmatpush3.bf16.msra.mxu0 %v1944_v28 }
 0x274   :  { %v1103_v3 = vsel %vm1079_vm2, %v1101_v42, %v1102_v43 }
 0x275   :  { %v1170_v41 = vmax.f32 %v1168_v39, %v1169_v44  ;;  %v1119_v46 = vadd.f32 %v1103_v3, %v2337_v5  ;;  %v1233_v47 = vunpack.c.l.b16 %v1194_v45 }
 0x276   :  { %v1958_v50 = vpop.eup %1957 }
 0x277   :  { %v1173_v51 = vrot.slane %v1958_v50, 4  ;;  %v1134_v52 = vadd.f32 %v2352_v48, %v1119_v46  ;;  %v1171_v53 = vrot.slane %v1170_v41, 1  ;;  %v1243_v54 = vsel %vm1242_vm5, %v1233_v47, %v1241_v37 }
 0x279   :  { %v1174_v55 = vmax.f32 %v1958_v50, %v1173_v51  ;;  %1961 = vtanh.f32 %v1134_v52  ;;  %v1172_v56 = vmax.f32 %v1170_v41, %v1171_v53  ;;  %v1650_v41 = vld [vmem:[%s2405_s12] ss:$0 sm:$0xff] }
 0x27a   :  { %1963 = vtanh.f32 %v430_v29  ;;  %v1651_v50 = vld [vmem:[#allocation2] ss:$0 sm:$0xff] }
 0x27b   :  { %v1175_v58 = vrot.slane %v1174_v55, 2  ;;  %v1195_v59 = vpack.c.bf16 %v1172_v56, %v1172_v56 }
 0x27d   :  { %v1176_v60 = vmax.f32 %v1174_v55, %v1175_v58  ;;  %v1234_v61 = vunpack.c.l.b16 %v1195_v59 }
 0x27e   :  { %v1960_v62 = vpop.eup %1959 }
 0x27f   :  { %v1179_v63 = vrot.slane %v1960_v62, 4  ;;  %v1177_v0 = vrot.slane %v1176_v60, 1  ;;  %v1245_v4 = vsel %vm1244_vm6, %v1234_v61, %v1243_v54 }
 0x281   :  { %v1180_v5 = vmax.f32 %v1960_v62, %v1179_v63  ;;  %v1178_v17 = vmax.f32 %v1176_v60, %v1177_v0 }
 0x283   :  { %v1181_v49 = vrot.slane %v1180_v5, 2  ;;  %v1196_v6 = vpack.c.bf16 %v1178_v17, %v1178_v17 }
 0x285   :  { %v1182_v48 = vmax.f32 %v1180_v5, %v1181_v49  ;;  %v1235_v7 = vunpack.c.l.b16 %v1196_v6 }
 0x286   :  { %v1962_v2 = vpop.eup %1961 }
 0x287   :  { %v1185_v9 = vrot.slane %v1962_v2, 4  ;;  %v1183_v10 = vrot.slane %v1182_v48, 1  ;;  %v1247_v8 = vsel %vm1246_vm7, %v1235_v7, %v1245_v4  ;;  %v1964_v36 = vpop.eup %1963 }
 0x288   :  { %v1343_v39 = vpack.c.bf16 %v1964_v36, %v1964_v36 }
 0x289   :  { %v1184_v11 = vmax.f32 %v1182_v48, %v1183_v10  ;;  %v1186_v12 = vmax.f32 %v1962_v2, %v1185_v9 }
 0x28b   :  { %v1187_v13 = vrot.slane %v1186_v12, 2  ;;  %v1197_v14 = vpack.c.bf16 %v1184_v11, %v1184_v11 }
 0x28d   :  { %v1188_v15 = vmax.f32 %v1186_v12, %v1187_v13  ;;  %v1236_v25 = vunpack.c.l.b16 %v1197_v14 }
 0x28f   :  { %v1189_v16 = vrot.slane %v1188_v15, 1  ;;  %v1249_v19 = vsel %vm1248_vm8, %v1236_v25, %v1247_v8 }
 0x291   :  { %v1190_v20 = vmax.f32 %v1188_v15, %v1189_v16 }
 0x293   :  { %v1198_v21 = vpack.c.bf16 %v1190_v20, %v1190_v20 }
 0x295   :  { %v1237_v22 = vunpack.c.l.b16 %v1198_v21 }
 0x297   :  { %v1251_v23 = vsel %vm1250_vm9, %v1237_v22, %v1249_v19 }
 0x298   :  { %v1252_v24 = vpack.c.b16 %v1251_v23, %v1251_v23 }
 0x29a   :  { %1815 = vmatmul.mubr.bf16.vlgmr.msra.gmra.mxu1 %v1252_v24 }
 0x35a   :  { %v1336_v31 = vpop.f32.mrf.mxu1 }
 0x35b   :  { %v1337_v32 = vadd.f32 %v1624_v30, %v1336_v31 }
 0x35c   :  { %v1816_v1 = vpop.f32.mrf.mxu1 }
 0x35d   :  { %1965 = vtanh.f32 %v1337_v32 }
 0x35e   :  { %v1339_v34 = vpop.f32.mrf.mxu1 }
 0x360   :  { %v1817_v35 = vpop.f32.mrf.mxu1 }
 0x36a   :  { %v1966_v37 = vpop.eup %1965 }
 0x36b   :  { %v1344_v38 = vpack.c.bf16 %v1966_v37, %v1966_v37 }
 0x36d   :  { %1512 = vmatprep.mubr.bf16.mxu0 %v1344_v38 }
 0x36e   :  { %1513 = vmatmul.mubr.bf16.vlgmr.msra.gmra.mxu0 %v1343_v39 }
 0x42e   :  { %v1772_v40 = vpop.f32.mrf.mxu0 }
 0x430   :  { %v1773_v42 = vpop.f32.mrf.mxu0 }
 0x431   :  { %v1774_v43 = vadd.f32 %v1773_v42, %v1772_v40 }
 0x432   :  { %v1775_v44 = vpop.f32.mrf.mxu0 }
 0x433   :  { %v1515_v45 = vadd.f32 %v1774_v43, %v1633_v18 }
 0x434   :  { %v1776_v3 = vpop.f32.mrf.mxu0 }
 0x435   :  { %1967 = vtanh.f32 %v1515_v45 }
 0x442   :  { %v1968_v46 = vpop.eup %1967 }
 0x443   :  { %v1528_v47 = vmul.f32 %v1968_v46, %v1650_v41 }
 0x445   :  { %1529 = vadd.xlane.f32.xlu0 %v1528_v47 }
 0x4ce   :  { %v1530_v51 = vpop.xlane.xlu0 %1529 }
 0x4cf   :  { %v1538_v52 = vadd.f32 %v1651_v50, %v1530_v51 }
 0x4d1   :  { %1540 = vst.msk [vmem:[%s2407_s14] sm:$0xff] %vm1539_vm10, %v1538_v52 }
 0x4d2   :  { %1545 = vsyncpa [#allocation4], 1 }
 0x4d3   :  { %1546 = vsyncpa [#allocation6], 1 }
 0x4d4   :  { %1547 = vsyncpa [#allocation9], 1 }
 0x4d5   :  { %1548 = vsyncpa [#allocation12], 1 }

</bundles_post_ra>
